<compile_context>
chip_gen: v6e
topology: v6e:2x2x1
jax: 0.10.0
libtpu: 0.0.40
codegen_flags: <defaults>
</compile_context>

<pallas_src>
import jax
import jax.numpy as jnp
from jax import lax
from jax.experimental import pallas as pl
from jax.experimental.pallas import tpu as pltpu


# ------------------------------ fused kernel --------------------------------

def _rfm_fused_kernel(
        # graph structure (int32 index columns) + features (f32)
        src_idx_ref, dst_idx_ref, egid_ref, ngid_ref,
        ef_ref, nf_ref, g_ref,
        # edge MLP params (weights bf16, biases f32 rows)
        w1e_ref, w1np_ref, w1gp_ref, b1e_ref, w2e_ref, b2e_ref,
        # node MLP params
        w1n_ref, w1h_ref, b1n_ref, w2n_ref, b2n_ref,
        # global MLP params
        w1nc_ref, w1ec_ref, b1u_ref, w2u_ref, b2u_ref,
        # outputs (true dim_out width, f32)
        e_out_ref, n_out_ref, u_out_ref):
    f32 = jnp.float32
    bf16 = jnp.bfloat16

    E = ef_ref.shape[0]
    N = nf_ref.shape[0]
    B = g_ref.shape[0]
    H = b1e_ref.shape[1]

    def mxu(a_bf, b_bf):
        # bf16 operands on the MXU, f32 accumulation.
        return jnp.dot(a_bf, b_bf, preferred_element_type=f32)

    def one_hot(idx_col_ref, n):
        rows = idx_col_ref.shape[0]
        iota = lax.broadcasted_iota(jnp.int32, (rows, n), 1)
        return (idx_col_ref[...] == iota).astype(bf16)

    def scatter_sum(onehot_bf, vals_f32):
        # onehot.T @ vals without materializing the transpose: contract axis 0.
        return lax.dot_general(onehot_bf, vals_f32.astype(bf16),
                               dimension_numbers=(((0,), (0,)), ((), ())),
                               preferred_element_type=f32)

    # 0/1 incidence masks rebuilt on the VPU from int32 indices (exact in bf16).
    src_oh = one_hot(src_idx_ref, N)        # (E, N)
    dst_oh = one_hot(dst_idx_ref, N)        # (E, N)
    e2g_oh = one_hot(egid_ref, B)           # (E, B)
    n2g_oh = one_hot(ngid_ref, B)           # (N, B)

    nf_bf = nf_ref[...].astype(bf16)        # cast shared operands once
    g_bf = g_ref[...].astype(bf16)

    # fused tiny-K projections (one wide MXU push per shared input)
    proj_nodes = mxu(nf_bf, w1np_ref[...])  # (N, 2H): [src-proj | dst-proj]
    proj_glob = mxu(g_bf, w1gp_ref[...])    # (B, 3H): [edge-u | node-u | u-u]
    proj_src = proj_nodes[:, :H].astype(bf16)
    proj_dst = proj_nodes[:, H:].astype(bf16)
    proj_ge = proj_glob[:, :H].astype(bf16)
    proj_gn = proj_glob[:, H:2 * H].astype(bf16)
    gu_term = proj_glob[:, 2 * H:]          # (B, H) f32, reused in global MLP

    # ---- 1) edge update: fc_edge2(relu(fc_edge([ef, src, dst, u]))) ---------
    h_e = (mxu(ef_ref[...].astype(bf16), w1e_ref[...])
           + mxu(src_oh, proj_src)
           + mxu(dst_oh, proj_dst)
           + mxu(e2g_oh, proj_ge)
           + b1e_ref[...])
    h_e = jnp.maximum(h_e, 0.0)
    e_out = mxu(h_e.astype(bf16), w2e_ref[...]) + b2e_ref[...]   # (E, P) f32
    e_out_ref[...] = e_out

    # ---- 2) message passing: h[v] = sum_{e: dst(e)=v} e_out[e] --------------
    h_node = scatter_sum(dst_oh, e_out)                          # (N, P)

    # ---- 3) node update: fc_node2(relu(fc_node([nf, h, u]))) ----------------
    h_n = (mxu(nf_bf, w1n_ref[...])
           + mxu(h_node.astype(bf16), w1h_ref[...])
           + mxu(n2g_oh, proj_gn)
           + b1n_ref[...])
    h_n = jnp.maximum(h_n, 0.0)
    n_out = mxu(h_n.astype(bf16), w2n_ref[...]) + b2n_ref[...]   # (N, P)
    n_out_ref[...] = n_out

    # ---- 4) global update: fc_u2(relu(fc_u([n_comb, e_comb, g]))) -----------
    e_comb = scatter_sum(e2g_oh, e_out)                          # (B, P)
    n_comb = scatter_sum(n2g_oh, n_out)                          # (B, P)
    h_u = (mxu(n_comb.astype(bf16), w1nc_ref[...])
           + mxu(e_comb.astype(bf16), w1ec_ref[...])
           + gu_term
           + b1u_ref[...])
    h_u = jnp.maximum(h_u, 0.0)
    u_out_ref[...] = mxu(h_u.astype(bf16), w2u_ref[...]) + b2u_ref[...]


# --------------------------- parameter handling ------------------------------

def init_linear(key, fan_in, fan_out):
    # Matches nn.Linear default init (uniform +-1/sqrt(fan_in)); weight stored
    # as (in, out) so the kernel computes x @ W (== x @ W_pt.T).
    kw, kb = jax.random.split(key)
    bound = 1.0 / float(fan_in) ** 0.5
    w = jax.random.uniform(kw, (fan_in, fan_out), jnp.float32, -bound, bound)
    b = jax.random.uniform(kb, (fan_out,), jnp.float32, -bound, bound)
    return w, b


def init_rfm_params(key, dim_in_node, dim_in_edge, dim_in_u, hidden_dim, dim_out):
    keys = jax.random.split(key, 6)
    return {
        "fc_edge": init_linear(keys[0], dim_in_edge, hidden_dim),
        "fc_edge2": init_linear(keys[1], hidden_dim, dim_out),
        "fc_node": init_linear(keys[2], dim_in_node, hidden_dim),
        "fc_node2": init_linear(keys[3], hidden_dim, dim_out),
        "fc_u": init_linear(keys[4], dim_in_u, hidden_dim),
        "fc_u2": init_linear(keys[5], hidden_dim, dim_out),
    }


def prepare_rfm_params(params, De, Dn, Du):
    """One-time weight prep (run OUTSIDE the per-step path): split each W1 by
    concat segment, fuse segments that share an input into one wide matmul,
    and cast weights to bf16 (biases stay f32 rows)."""
    bf16 = jnp.bfloat16
    w1e, b1e = params["fc_edge"]
    w2e, b2e = params["fc_edge2"]
    w1n, b1n = params["fc_node"]
    w2n, b2n = params["fc_node2"]
    w1u, b1u = params["fc_u"]
    w2u, b2u = params["fc_u2"]
    dim_out = w2e.shape[1]

    def row(b):
        return b.reshape(1, -1).astype(jnp.float32)

    return (
        # edge MLP, concat order [edge_feat, src_nf, dst_nf, u_per_edge]
        w1e[:De].astype(bf16),                                             # (De, H)
        jnp.concatenate([w1e[De:De + Dn],
                         w1e[De + Dn:De + 2 * Dn]], axis=1).astype(bf16),  # (Dn, 2H)
        jnp.concatenate([w1e[De + 2 * Dn:],                                # edge-u
                         w1n[Dn + dim_out:],                               # node-u
                         w1u[2 * dim_out:]], axis=1).astype(bf16),         # (Du, 3H)
        row(b1e),
        w2e.astype(bf16), row(b2e),
        # node MLP, concat order [node_feat, h, u_per_node]
        w1n[:Dn].astype(bf16),
        w1n[Dn:Dn + dim_out].astype(bf16),
        row(b1n),
        w2n.astype(bf16), row(b2n),
        # global MLP, concat order [n_comb, e_comb, g_repr]
        w1u[:dim_out].astype(bf16),
        w1u[dim_out:2 * dim_out].astype(bf16),
        row(b1u),
        w2u.astype(bf16), row(b2u),
    )


# ------------------------------ forward pass ---------------------------------

def rfm_block_forward(prepared, src_idx, dst_idx, edge_gid, node_gid,
                      edge_feat, node_feat, g_repr):
    E, De = edge_feat.shape
    N, Dn = node_feat.shape
    B, Du = g_repr.shape
    H = prepared[3].shape[1]          # b1e is (1, H)
    dim_out = prepared[5].shape[1]    # b2e is (1, dim_out)

    col = lambda v: v.reshape(-1, 1).astype(jnp.int32)
    inputs = (col(src_idx), col(dst_idx), col(edge_gid), col(node_gid),
              edge_feat, node_feat, g_repr) + tuple(prepared)

    out_shape = (jax.ShapeDtypeStruct((E, dim_out), jnp.float32),
                 jax.ShapeDtypeStruct((N, dim_out), jnp.float32),
                 jax.ShapeDtypeStruct((B, dim_out), jnp.float32))

    # VMEM limit sized from the actual resident buffers (with headroom).
    in_bytes = sum(int(x.size) * x.dtype.itemsize for x in inputs)
    out_bytes = 4 * (E + N + B) * dim_out
    vmem_limit = int(min(100 << 20,
                         max(32 << 20, 2 * (in_bytes + out_bytes) + (4 << 20))))

    flops = 2 * (N * Dn * 2 * H + B * Du * 3 * H          # fused projections
                 + E * (De + B) * H + 2 * E * N * H       # edge layer 1
                 + E * H * dim_out                        # edge layer 2
                 + E * N * dim_out                        # message scatter
                 + N * (Dn + dim_out + B) * H             # node layer 1
                 + N * H * dim_out                        # node layer 2
                 + (E + N) * B * dim_out                  # graph pooling
                 + B * 2 * dim_out * H + B * H * dim_out) # global MLP

    vmem = lambda: pl.BlockSpec(memory_space=pltpu.MemorySpace.VMEM)

    e_out, n_out, u_out = pl.pallas_call(
        _rfm_fused_kernel,
        out_shape=out_shape,
        in_specs=[vmem() for _ in inputs],
        out_specs=(vmem(), vmem(), vmem()),
        compiler_params=pltpu.CompilerParams(vmem_limit_bytes=vmem_limit),
        cost_estimate=pl.CostEstimate(flops=flops, transcendentals=0,
                                      bytes_accessed=in_bytes + out_bytes),
    )(*inputs)
    return e_out, n_out, u_out


# pure-JAX f32 reference for correctness checking
def rfm_block_reference(params, src, dst, egid, ngid,
                        edge_feat, node_feat, g_repr):
    def mlp(x, p1, p2):
        return jnp.maximum(x @ p1[0] + p1[1], 0.0) @ p2[0] + p2[1]

    N = node_feat.shape[0]
    B = g_repr.shape[0]
    edge_inp = jnp.concatenate(
        [edge_feat, node_feat[src], node_feat[dst], g_repr[egid]], -1)
    e_out = mlp(edge_inp, params["fc_edge"], params["fc_edge2"])
    h = jax.ops.segment_sum(e_out, dst, num_segments=N)
    node_inp = jnp.concatenate([node_feat, h, g_repr[ngid]], -1)
    n_out = mlp(node_inp, params["fc_node"], params["fc_node2"])
    n_comb = jax.ops.segment_sum(n_out, ngid, num_segments=B)
    e_comb = jax.ops.segment_sum(e_out, egid, num_segments=B)
    u_inp = jnp.concatenate([n_comb, e_comb, g_repr], -1)
    u_out = mlp(u_inp, params["fc_u"], params["fc_u2"])
    return e_out, n_out, u_out


# --------------------------------- main ---------------------------------------

if __name__ == "__main__":
    key = jax.random.PRNGKey(0)

    # feature sizes
    De, Dn, Du = 6, 5, 7                  # edge / node / global input dims
    hidden_dim, dim_out = 32, 16
    dim_in_edge = De + 2 * Dn + Du        # [edge, src, dst, u]
    dim_in_node = Dn + dim_out + Du       # [node, h, u]
    dim_in_u = 2 * dim_out + Du           # [n_comb, e_comb, u]

    # batch of B=2 identical-topology graphs, 4 nodes / 6 directed edges each
    B, N_per, E_per = 2, 4, 6
    base_src = jnp.array([0, 1, 2, 3, 0, 1], dtype=jnp.int32)
    base_dst = jnp.array([1, 2, 3, 0, 2, 3], dtype=jnp.int32)
    src = jnp.concatenate([base_src + g * N_per for g in range(B)])
    dst = jnp.concatenate([base_dst + g * N_per for g in range(B)])
    N, E = B * N_per, B * E_per
    edge_gid = jnp.repeat(jnp.arange(B, dtype=jnp.int32), E_per)
    node_gid = jnp.repeat(jnp.arange(B, dtype=jnp.int32), N_per)

    k_e, k_n, k_u, k_p = jax.random.split(key, 4)
    edge_feat = jax.random.normal(k_e, (E, De), jnp.float32)
    node_feat = jax.random.normal(k_n, (N, Dn), jnp.float32)
    g_repr = jax.random.normal(k_u, (B, Du), jnp.float32)

    params = init_rfm_params(k_p, dim_in_node, dim_in_edge, dim_in_u,
                             hidden_dim, dim_out)
    prepared = prepare_rfm_params(params, De, Dn, Du)   # one-time, outside jit

    fwd = jax.jit(rfm_block_forward)
    e_out, n_out, u_out = jax.block_until_ready(
        fwd(prepared, src, dst, edge_gid, node_gid,
            edge_feat, node_feat, g_repr))

    # sanity: shapes + numerics vs pure-JAX f32 reference.
    # Tolerance is loose because all MXU matmuls (incl. the one-hot
    # gather/scatter selections) use bf16 operands with f32 accumulation,
    # per the performance review.
    assert e_out.shape == (E, dim_out)
    assert n_out.shape == (N, dim_out)
    assert u_out.shape == (B, dim_out)
    e_ref, n_ref, u_ref = rfm_block_reference(params, src, dst, edge_gid,
                                              node_gid, edge_feat, node_feat,
                                              g_repr)
    assert jnp.allclose(e_out, e_ref, atol=5e-2, rtol=5e-2)
    assert jnp.allclose(n_out, n_ref, atol=5e-2, rtol=5e-2)
    assert jnp.allclose(u_out, u_ref, atol=5e-2, rtol=5e-2)

    print("KERNEL_OK")
</pallas_src>

<mosaic_0001>
module attributes {stable_mosaic.version = 11 : i64} {
  func.func @_rfm_fused_kernel(%arg0: memref<12x1xi32, #tpu.memory_space<vmem>>, %arg1: memref<12x1xi32, #tpu.memory_space<vmem>>, %arg2: memref<12x1xi32, #tpu.memory_space<vmem>>, %arg3: memref<8x1xi32, #tpu.memory_space<vmem>>, %arg4: memref<12x6xf32, #tpu.memory_space<vmem>>, %arg5: memref<8x5xf32, #tpu.memory_space<vmem>>, %arg6: memref<2x7xf32, #tpu.memory_space<vmem>>, %arg7: memref<6x32xbf16, #tpu.memory_space<vmem>>, %arg8: memref<5x64xbf16, #tpu.memory_space<vmem>>, %arg9: memref<7x96xbf16, #tpu.memory_space<vmem>>, %arg10: memref<1x32xf32, #tpu.memory_space<vmem>>, %arg11: memref<32x16xbf16, #tpu.memory_space<vmem>>, %arg12: memref<1x16xf32, #tpu.memory_space<vmem>>, %arg13: memref<5x32xbf16, #tpu.memory_space<vmem>>, %arg14: memref<16x32xbf16, #tpu.memory_space<vmem>>, %arg15: memref<1x32xf32, #tpu.memory_space<vmem>>, %arg16: memref<32x16xbf16, #tpu.memory_space<vmem>>, %arg17: memref<1x16xf32, #tpu.memory_space<vmem>>, %arg18: memref<16x32xbf16, #tpu.memory_space<vmem>>, %arg19: memref<16x32xbf16, #tpu.memory_space<vmem>>, %arg20: memref<1x32xf32, #tpu.memory_space<vmem>>, %arg21: memref<32x16xbf16, #tpu.memory_space<vmem>>, %arg22: memref<1x16xf32, #tpu.memory_space<vmem>>, %arg23: memref<12x16xf32, #tpu.memory_space<vmem>>, %arg24: memref<8x16xf32, #tpu.memory_space<vmem>>, %arg25: memref<2x16xf32, #tpu.memory_space<vmem>>) attributes {dimension_semantics = [], scalar_prefetch = 0 : i64, scratch_operands = 0 : i64, tpu.core_type = #tpu.core_type<tc>} {
    %0 = tpu.iota {dimensions = array<i32: 1>} : vector<12x8xi32>
    %c0 = arith.constant 0 : index
    %c0_0 = arith.constant 0 : index
    %1 = vector.load %arg0[%c0, %c0_0] : memref<12x1xi32, #tpu.memory_space<vmem>>, vector<12x1xi32>
    %2 = vector.broadcast %1 : vector<12x1xi32> to vector<12x8xi32>
    %3 = arith.cmpi eq, %2, %0 : vector<12x8xi32>
    %4 = arith.extui %3 : vector<12x8xi1> to vector<12x8xi32>
    %5 = arith.sitofp %4 : vector<12x8xi32> to vector<12x8xf32>
    %6 = arith.truncf %5 : vector<12x8xf32> to vector<12x8xbf16>
    %7 = tpu.iota {dimensions = array<i32: 1>} : vector<12x8xi32>
    %c0_1 = arith.constant 0 : index
    %c0_2 = arith.constant 0 : index
    %8 = vector.load %arg1[%c0_1, %c0_2] : memref<12x1xi32, #tpu.memory_space<vmem>>, vector<12x1xi32>
    %9 = vector.broadcast %8 : vector<12x1xi32> to vector<12x8xi32>
    %10 = arith.cmpi eq, %9, %7 : vector<12x8xi32>
    %11 = arith.extui %10 : vector<12x8xi1> to vector<12x8xi32>
    %12 = arith.sitofp %11 : vector<12x8xi32> to vector<12x8xf32>
    %13 = arith.truncf %12 : vector<12x8xf32> to vector<12x8xbf16>
    %14 = tpu.iota {dimensions = array<i32: 1>} : vector<12x2xi32>
    %c0_3 = arith.constant 0 : index
    %c0_4 = arith.constant 0 : index
    %15 = vector.load %arg2[%c0_3, %c0_4] : memref<12x1xi32, #tpu.memory_space<vmem>>, vector<12x1xi32>
    %16 = vector.broadcast %15 : vector<12x1xi32> to vector<12x2xi32>
    %17 = arith.cmpi eq, %16, %14 : vector<12x2xi32>
    %18 = arith.extui %17 : vector<12x2xi1> to vector<12x2xi32>
    %19 = arith.sitofp %18 : vector<12x2xi32> to vector<12x2xf32>
    %20 = arith.truncf %19 : vector<12x2xf32> to vector<12x2xbf16>
    %21 = tpu.iota {dimensions = array<i32: 1>} : vector<8x2xi32>
    %c0_5 = arith.constant 0 : index
    %c0_6 = arith.constant 0 : index
    %22 = vector.load %arg3[%c0_5, %c0_6] : memref<8x1xi32, #tpu.memory_space<vmem>>, vector<8x1xi32>
    %23 = vector.broadcast %22 : vector<8x1xi32> to vector<8x2xi32>
    %24 = arith.cmpi eq, %23, %21 : vector<8x2xi32>
    %25 = arith.extui %24 : vector<8x2xi1> to vector<8x2xi32>
    %26 = arith.sitofp %25 : vector<8x2xi32> to vector<8x2xf32>
    %27 = arith.truncf %26 : vector<8x2xf32> to vector<8x2xbf16>
    %c0_7 = arith.constant 0 : index
    %c0_8 = arith.constant 0 : index
    %28 = vector.load %arg5[%c0_7, %c0_8] : memref<8x5xf32, #tpu.memory_space<vmem>>, vector<8x5xf32>
    %29 = arith.truncf %28 : vector<8x5xf32> to vector<8x5xbf16>
    %c0_9 = arith.constant 0 : index
    %c0_10 = arith.constant 0 : index
    %30 = vector.load %arg6[%c0_9, %c0_10] : memref<2x7xf32, #tpu.memory_space<vmem>>, vector<2x7xf32>
    %31 = arith.truncf %30 : vector<2x7xf32> to vector<2x7xbf16>
    %c0_11 = arith.constant 0 : index
    %c0_12 = arith.constant 0 : index
    %32 = vector.load %arg8[%c0_11, %c0_12] : memref<5x64xbf16, #tpu.memory_space<vmem>>, vector<5x64xbf16>
    %cst = arith.constant dense<0.000000e+00> : vector<8x64xf32>
    %33 = tpu.matmul %29, %32, %cst {dimension_numbers = #tpu.dot_dimension_numbers<[1], [0], [0], [1], [0, 0, 1, 1], [], []>} : vector<8x5xbf16>, vector<5x64xbf16>, vector<8x64xf32> -> vector<8x64xf32>
    %c0_13 = arith.constant 0 : index
    %c0_14 = arith.constant 0 : index
    %34 = vector.load %arg9[%c0_13, %c0_14] : memref<7x96xbf16, #tpu.memory_space<vmem>>, vector<7x96xbf16>
    %cst_15 = arith.constant dense<0.000000e+00> : vector<2x96xf32>
    %35 = tpu.matmul %31, %34, %cst_15 {dimension_numbers = #tpu.dot_dimension_numbers<[1], [0], [0], [1], [0, 0, 1, 1], [], []>} : vector<2x7xbf16>, vector<7x96xbf16>, vector<2x96xf32> -> vector<2x96xf32>
    %36 = vector.extract_strided_slice %33 {offsets = [0, 0], sizes = [8, 32], strides = [1, 1]} : vector<8x64xf32> to vector<8x32xf32>
    %37 = arith.truncf %36 : vector<8x32xf32> to vector<8x32xbf16>
    %38 = vector.extract_strided_slice %33 {offsets = [0, 32], sizes = [8, 32], strides = [1, 1]} : vector<8x64xf32> to vector<8x32xf32>
    %39 = arith.truncf %38 : vector<8x32xf32> to vector<8x32xbf16>
    %40 = vector.extract_strided_slice %35 {offsets = [0, 0], sizes = [2, 32], strides = [1, 1]} : vector<2x96xf32> to vector<2x32xf32>
    %41 = arith.truncf %40 : vector<2x32xf32> to vector<2x32xbf16>
    %42 = vector.extract_strided_slice %35 {offsets = [0, 32], sizes = [2, 32], strides = [1, 1]} : vector<2x96xf32> to vector<2x32xf32>
    %43 = arith.truncf %42 : vector<2x32xf32> to vector<2x32xbf16>
    %44 = vector.extract_strided_slice %35 {offsets = [0, 64], sizes = [2, 32], strides = [1, 1]} : vector<2x96xf32> to vector<2x32xf32>
    %c0_16 = arith.constant 0 : index
    %c0_17 = arith.constant 0 : index
    %45 = vector.load %arg4[%c0_16, %c0_17] : memref<12x6xf32, #tpu.memory_space<vmem>>, vector<12x6xf32>
    %46 = arith.truncf %45 : vector<12x6xf32> to vector<12x6xbf16>
    %c0_18 = arith.constant 0 : index
    %c0_19 = arith.constant 0 : index
    %47 = vector.load %arg7[%c0_18, %c0_19] : memref<6x32xbf16, #tpu.memory_space<vmem>>, vector<6x32xbf16>
    %cst_20 = arith.constant dense<0.000000e+00> : vector<12x32xf32>
    %48 = tpu.matmul %46, %47, %cst_20 {dimension_numbers = #tpu.dot_dimension_numbers<[1], [0], [0], [1], [0, 0, 1, 1], [], []>} : vector<12x6xbf16>, vector<6x32xbf16>, vector<12x32xf32> -> vector<12x32xf32>
    %cst_21 = arith.constant dense<0.000000e+00> : vector<12x32xf32>
    %49 = tpu.matmul %6, %37, %cst_21 {dimension_numbers = #tpu.dot_dimension_numbers<[1], [0], [0], [1], [0, 0, 1, 1], [], []>} : vector<12x8xbf16>, vector<8x32xbf16>, vector<12x32xf32> -> vector<12x32xf32>
    %50 = arith.addf %48, %49 : vector<12x32xf32>
    %cst_22 = arith.constant dense<0.000000e+00> : vector<12x32xf32>
    %51 = tpu.matmul %13, %39, %cst_22 {dimension_numbers = #tpu.dot_dimension_numbers<[1], [0], [0], [1], [0, 0, 1, 1], [], []>} : vector<12x8xbf16>, vector<8x32xbf16>, vector<12x32xf32> -> vector<12x32xf32>
    %52 = arith.addf %50, %51 : vector<12x32xf32>
    %cst_23 = arith.constant dense<0.000000e+00> : vector<12x32xf32>
    %53 = tpu.matmul %20, %41, %cst_23 {dimension_numbers = #tpu.dot_dimension_numbers<[1], [0], [0], [1], [0, 0, 1, 1], [], []>} : vector<12x2xbf16>, vector<2x32xbf16>, vector<12x32xf32> -> vector<12x32xf32>
    %54 = arith.addf %52, %53 : vector<12x32xf32>
    %c0_24 = arith.constant 0 : index
    %c0_25 = arith.constant 0 : index
    %55 = vector.load %arg10[%c0_24, %c0_25] : memref<1x32xf32, #tpu.memory_space<vmem>>, vector<1x32xf32>
    %56 = vector.broadcast %55 : vector<1x32xf32> to vector<12x32xf32>
    %57 = arith.addf %54, %56 : vector<12x32xf32>
    %cst_26 = arith.constant 0.000000e+00 : f32
    %58 = vector.broadcast %cst_26 : f32 to vector<12x32xf32>
    %59 = arith.maximumf %57, %58 : vector<12x32xf32>
    %60 = arith.truncf %59 : vector<12x32xf32> to vector<12x32xbf16>
    %c0_27 = arith.constant 0 : index
    %c0_28 = arith.constant 0 : index
    %61 = vector.load %arg11[%c0_27, %c0_28] : memref<32x16xbf16, #tpu.memory_space<vmem>>, vector<32x16xbf16>
    %cst_29 = arith.constant dense<0.000000e+00> : vector<12x16xf32>
    %62 = tpu.matmul %60, %61, %cst_29 {dimension_numbers = #tpu.dot_dimension_numbers<[1], [0], [0], [1], [0, 0, 1, 1], [], []>} : vector<12x32xbf16>, vector<32x16xbf16>, vector<12x16xf32> -> vector<12x16xf32>
    %c0_30 = arith.constant 0 : index
    %c0_31 = arith.constant 0 : index
    %63 = vector.load %arg12[%c0_30, %c0_31] : memref<1x16xf32, #tpu.memory_space<vmem>>, vector<1x16xf32>
    %64 = vector.broadcast %63 : vector<1x16xf32> to vector<12x16xf32>
    %65 = arith.addf %62, %64 : vector<12x16xf32>
    %c0_32 = arith.constant 0 : index
    %c0_33 = arith.constant 0 : index
    %66 = vector.load %arg23[%c0_32, %c0_33] : memref<12x16xf32, #tpu.memory_space<vmem>>, vector<12x16xf32>
    tpu.vector_store %arg23[%c0_32, %c0_33], %65 {strides = array<i32>} : memref<12x16xf32, #tpu.memory_space<vmem>>, vector<12x16xf32>,
    %67 = arith.truncf %65 : vector<12x16xf32> to vector<12x16xbf16>
    %cst_34 = arith.constant dense<0.000000e+00> : vector<8x16xf32>
    %68 = tpu.matmul %13, %67, %cst_34 {dimension_numbers = #tpu.dot_dimension_numbers<[0], [0], [1], [1], [0, 1, 1, 1], [], []>} : vector<12x8xbf16>, vector<12x16xbf16>, vector<8x16xf32> -> vector<8x16xf32>
    %c0_35 = arith.constant 0 : index
    %c0_36 = arith.constant 0 : index
    %69 = vector.load %arg13[%c0_35, %c0_36] : memref<5x32xbf16, #tpu.memory_space<vmem>>, vector<5x32xbf16>
    %cst_37 = arith.constant dense<0.000000e+00> : vector<8x32xf32>
    %70 = tpu.matmul %29, %69, %cst_37 {dimension_numbers = #tpu.dot_dimension_numbers<[1], [0], [0], [1], [0, 0, 1, 1], [], []>} : vector<8x5xbf16>, vector<5x32xbf16>, vector<8x32xf32> -> vector<8x32xf32>
    %71 = arith.truncf %68 : vector<8x16xf32> to vector<8x16xbf16>
    %c0_38 = arith.constant 0 : index
    %c0_39 = arith.constant 0 : index
    %72 = vector.load %arg14[%c0_38, %c0_39] : memref<16x32xbf16, #tpu.memory_space<vmem>>, vector<16x32xbf16>
    %cst_40 = arith.constant dense<0.000000e+00> : vector<8x32xf32>
    %73 = tpu.matmul %71, %72, %cst_40 {dimension_numbers = #tpu.dot_dimension_numbers<[1], [0], [0], [1], [0, 0, 1, 1], [], []>} : vector<8x16xbf16>, vector<16x32xbf16>, vector<8x32xf32> -> vector<8x32xf32>
    %74 = arith.addf %70, %73 : vector<8x32xf32>
    %cst_41 = arith.constant dense<0.000000e+00> : vector<8x32xf32>
    %75 = tpu.matmul %27, %43, %cst_41 {dimension_numbers = #tpu.dot_dimension_numbers<[1], [0], [0], [1], [0, 0, 1, 1], [], []>} : vector<8x2xbf16>, vector<2x32xbf16>, vector<8x32xf32> -> vector<8x32xf32>
    %76 = arith.addf %74, %75 : vector<8x32xf32>
    %c0_42 = arith.constant 0 : index
    %c0_43 = arith.constant 0 : index
    %77 = vector.load %arg15[%c0_42, %c0_43] : memref<1x32xf32, #tpu.memory_space<vmem>>, vector<1x32xf32>
    %78 = vector.broadcast %77 : vector<1x32xf32> to vector<8x32xf32>
    %79 = arith.addf %76, %78 : vector<8x32xf32>
    %cst_44 = arith.constant 0.000000e+00 : f32
    %80 = vector.broadcast %cst_44 : f32 to vector<8x32xf32>
    %81 = arith.maximumf %79, %80 : vector<8x32xf32>
    %82 = arith.truncf %81 : vector<8x32xf32> to vector<8x32xbf16>
    %c0_45 = arith.constant 0 : index
    %c0_46 = arith.constant 0 : index
    %83 = vector.load %arg16[%c0_45, %c0_46] : memref<32x16xbf16, #tpu.memory_space<vmem>>, vector<32x16xbf16>
    %cst_47 = arith.constant dense<0.000000e+00> : vector<8x16xf32>
    %84 = tpu.matmul %82, %83, %cst_47 {dimension_numbers = #tpu.dot_dimension_numbers<[1], [0], [0], [1], [0, 0, 1, 1], [], []>} : vector<8x32xbf16>, vector<32x16xbf16>, vector<8x16xf32> -> vector<8x16xf32>
    %c0_48 = arith.constant 0 : index
    %c0_49 = arith.constant 0 : index
    %85 = vector.load %arg17[%c0_48, %c0_49] : memref<1x16xf32, #tpu.memory_space<vmem>>, vector<1x16xf32>
    %86 = vector.broadcast %85 : vector<1x16xf32> to vector<8x16xf32>
    %87 = arith.addf %84, %86 : vector<8x16xf32>
    %c0_50 = arith.constant 0 : index
    %c0_51 = arith.constant 0 : index
    %88 = vector.load %arg24[%c0_50, %c0_51] : memref<8x16xf32, #tpu.memory_space<vmem>>, vector<8x16xf32>
    tpu.vector_store %arg24[%c0_50, %c0_51], %87 {strides = array<i32>} : memref<8x16xf32, #tpu.memory_space<vmem>>, vector<8x16xf32>,
    %89 = arith.truncf %65 : vector<12x16xf32> to vector<12x16xbf16>
    %cst_52 = arith.constant dense<0.000000e+00> : vector<2x16xf32>
    %90 = tpu.matmul %20, %89, %cst_52 {dimension_numbers = #tpu.dot_dimension_numbers<[0], [0], [1], [1], [0, 1, 1, 1], [], []>} : vector<12x2xbf16>, vector<12x16xbf16>, vector<2x16xf32> -> vector<2x16xf32>
    %91 = arith.truncf %87 : vector<8x16xf32> to vector<8x16xbf16>
    %cst_53 = arith.constant dense<0.000000e+00> : vector<2x16xf32>
    %92 = tpu.matmul %27, %91, %cst_53 {dimension_numbers = #tpu.dot_dimension_numbers<[0], [0], [1], [1], [0, 1, 1, 1], [], []>} : vector<8x2xbf16>, vector<8x16xbf16>, vector<2x16xf32> -> vector<2x16xf32>
    %93 = arith.truncf %92 : vector<2x16xf32> to vector<2x16xbf16>
    %c0_54 = arith.constant 0 : index
    %c0_55 = arith.constant 0 : index
    %94 = vector.load %arg18[%c0_54, %c0_55] : memref<16x32xbf16, #tpu.memory_space<vmem>>, vector<16x32xbf16>
    %cst_56 = arith.constant dense<0.000000e+00> : vector<2x32xf32>
    %95 = tpu.matmul %93, %94, %cst_56 {dimension_numbers = #tpu.dot_dimension_numbers<[1], [0], [0], [1], [0, 0, 1, 1], [], []>} : vector<2x16xbf16>, vector<16x32xbf16>, vector<2x32xf32> -> vector<2x32xf32>
    %96 = arith.truncf %90 : vector<2x16xf32> to vector<2x16xbf16>
    %c0_57 = arith.constant 0 : index
    %c0_58 = arith.constant 0 : index
    %97 = vector.load %arg19[%c0_57, %c0_58] : memref<16x32xbf16, #tpu.memory_space<vmem>>, vector<16x32xbf16>
    %cst_59 = arith.constant dense<0.000000e+00> : vector<2x32xf32>
    %98 = tpu.matmul %96, %97, %cst_59 {dimension_numbers = #tpu.dot_dimension_numbers<[1], [0], [0], [1], [0, 0, 1, 1], [], []>} : vector<2x16xbf16>, vector<16x32xbf16>, vector<2x32xf32> -> vector<2x32xf32>
    %99 = arith.addf %95, %98 : vector<2x32xf32>
    %100 = arith.addf %99, %44 : vector<2x32xf32>
    %c0_60 = arith.constant 0 : index
    %c0_61 = arith.constant 0 : index
    %101 = vector.load %arg20[%c0_60, %c0_61] : memref<1x32xf32, #tpu.memory_space<vmem>>, vector<1x32xf32>
    %102 = vector.broadcast %101 : vector<1x32xf32> to vector<2x32xf32>
    %103 = arith.addf %100, %102 : vector<2x32xf32>
    %cst_62 = arith.constant 0.000000e+00 : f32
    %104 = vector.broadcast %cst_62 : f32 to vector<2x32xf32>
    %105 = arith.maximumf %103, %104 : vector<2x32xf32>
    %106 = arith.truncf %105 : vector<2x32xf32> to vector<2x32xbf16>
    %c0_63 = arith.constant 0 : index
    %c0_64 = arith.constant 0 : index
    %107 = vector.load %arg21[%c0_63, %c0_64] : memref<32x16xbf16, #tpu.memory_space<vmem>>, vector<32x16xbf16>
    %cst_65 = arith.constant dense<0.000000e+00> : vector<2x16xf32>
    %108 = tpu.matmul %106, %107, %cst_65 {dimension_numbers = #tpu.dot_dimension_numbers<[1], [0], [0], [1], [0, 0, 1, 1], [], []>} : vector<2x32xbf16>, vector<32x16xbf16>, vector<2x16xf32> -> vector<2x16xf32>
    %c0_66 = arith.constant 0 : index
    %c0_67 = arith.constant 0 : index
    %109 = vector.load %arg22[%c0_66, %c0_67] : memref<1x16xf32, #tpu.memory_space<vmem>>, vector<1x16xf32>
    %110 = vector.broadcast %109 : vector<1x16xf32> to vector<2x16xf32>
    %111 = arith.addf %108, %110 : vector<2x16xf32>
    %c0_68 = arith.constant 0 : index
    %c0_69 = arith.constant 0 : index
    %112 = vector.load %arg25[%c0_68, %c0_69] : memref<2x16xf32, #tpu.memory_space<vmem>>, vector<2x16xf32>
    tpu.vector_store %arg25[%c0_68, %c0_69], %111 {strides = array<i32>} : memref<2x16xf32, #tpu.memory_space<vmem>>, vector<2x16xf32>,
    return
  }
}

</mosaic_0001>

<bundles_post_ra>
// kernel: rfm_block_forward.1
= control target key start
LH: loop header
LB: loop body
LE: loop exit
PB: predicated region body
PF: predicated region fallthrough
CT: control target
= control target key end

     0   :  { %s1789_s0 = inlined_call_operand.vmem [shape: s32[12,1], index: 0, kind: input, shape index: {}]   ;;  %s1790_s1 = inlined_call_operand.vmem [shape: s32[12,1], index: 1, kind: input, shape index: {}]   ;;  %s1791_s2 = inlined_call_operand.vmem [shape: s32[12,1], index: 2, kind: input, shape index: {}]   ;;  %s1792_s3 = inlined_call_operand.vmem [shape: s32[8,1], index: 3, kind: input, shape index: {}]   ;;  %s1793_s4 = inlined_call_operand.vmem [shape: f32[12,6], index: 4, kind: input, shape index: {}]   ;;  %s1794_s5 = inlined_call_operand.vmem [shape: f32[8,5], index: 5, kind: input, shape index: {}]   ;;  %s1795_s6 = inlined_call_operand.vmem [shape: f32[2,7], index: 6, kind: input, shape index: {}]   ;;  %s1796_s7 = inlined_call_operand.vmem [shape: bf16[6,32], index: 7, kind: input, shape index: {}]   ;;  %s1797_s8 = inlined_call_operand.vmem [shape: bf16[5,64], index: 8, kind: input, shape index: {}]   ;;  %s1798_s9 = inlined_call_operand.vmem [shape: bf16[7,96], index: 9, kind: input, shape index: {}]   ;;  %s1799_s10 = inlined_call_operand.vmem [shape: f32[1,32], index: 10, kind: input, shape index: {}]   ;;  %s1800_s11 = inlined_call_operand.vmem [shape: bf16[32,16], index: 11, kind: input, shape index: {}]   ;;  %s1801_s12 = inlined_call_operand.vmem [shape: f32[1,16], index: 12, kind: input, shape index: {}]   ;;  %s1802_s13 = inlined_call_operand.vmem [shape: bf16[5,32], index: 13, kind: input, shape index: {}]   ;;  %s1803_s14 = inlined_call_operand.vmem [shape: bf16[16,32], index: 14, kind: input, shape index: {}]   ;;  %s1804_s15 = inlined_call_operand.vmem [shape: f32[1,32], index: 15, kind: input, shape index: {}]   ;;  %s1805_s16 = inlined_call_operand.vmem [shape: bf16[32,16], index: 16, kind: input, shape index: {}]   ;;  %s1806_s17 = inlined_call_operand.vmem [shape: f32[1,16], index: 17, kind: input, shape index: {}]   ;;  %s1807_s18 = inlined_call_operand.vmem [shape: bf16[16,32], index: 18, kind: input, shape index: {}]   ;;  %s1808_s19 = inlined_call_operand.vmem [shape: bf16[16,32], index: 19, kind: input, shape index: {}]   ;;  %s1809_s20 = inlined_call_operand.vmem [shape: f32[1,32], index: 20, kind: input, shape index: {}]   ;;  %s1810_s21 = inlined_call_operand.vmem [shape: bf16[32,16], index: 21, kind: input, shape index: {}]   ;;  %s1811_s22 = inlined_call_operand.vmem [shape: f32[1,16], index: 22, kind: input, shape index: {}]   ;;  %s1812_s23 = inlined_call_operand.hbm [shape: f32[12,16], index: 23, kind: output, shape index: {0}]   ;;  %s1813_s24 = inlined_call_operand.hbm [shape: f32[8,16], index: 24, kind: output, shape index: {1}]   ;;  %s1814_s25 = inlined_call_operand.hbm [shape: f32[2,16], index: 25, kind: output, shape index: {2}]  }
   0x1   :  { %1819 = sst [smem:[#allocation9_spill]] %s1789_s0 }
   0x2   :  { %1820 = sst [smem:[#allocation10_spill]] %s1790_s1 }
   0x3   :  { %1821 = sst [smem:[#allocation11_spill]] %s1791_s2 }
   0x4   :  { %1822 = sst [smem:[#allocation12_spill]] %s1792_s3 }
   0x5   :  { %1823 = sst [smem:[#allocation13_spill]] %s1793_s4 }
   0x6   :  { %1824 = sst [smem:[#allocation14_spill]] %s1794_s5 }
   0x7   :  { %1825 = sst [smem:[#allocation15_spill]] %s1795_s6 }
   0x8   :  { %1826 = sst [smem:[#allocation16_spill]] %s1796_s7 }
   0x9   :  { %1827 = sst [smem:[#allocation17_spill]] %s1797_s8 }
   0xa   :  { %1828 = sst [smem:[#allocation18_spill]] %s1798_s9 }
   0xb   :  { %31 = vsyncpa [#allocation3], 0  ;;  %s1829_s6 = sld [smem:[#allocation17_spill]]  ;;  %vm144_vm0 = vcmask 1041408   ;;  %vm145_vm1 = vcmask 1042432   ;;  %v1441_v1 = vmov 0.0  }
   0xc   :  { %1247 = vmatprep.subr.bf16.mxu0 %v1441_v1  ;;  %v1442_v2 = vmov 65535   ;;  %s1830_s3 = sld [smem:[#allocation14_spill]]  ;;  %1253 = vmatprep.subr.bf16.mxu1 %v1441_v1  ;;  %vm1443_vm2 = vmmov 0   ;;  %vm196_vm3 = vcmask 1043456   ;;  %vm140_vm4 = vcmask 39936  }
   0xd   :  { %v146_v3 = vsel %vm144_vm0, 4294967295, %v1442_v2  ;;  %1249 = vmatprep.mubr.msk.bf16.mxu0 %vm1443_vm2, %v1441_v1  ;;  %s1831_s8 = sld [smem:[#allocation18_spill]]  ;;  %v197_v7 = vsel %vm145_vm1, 4294967295, %v1442_v2  ;;  %1255 = vmatprep.mubr.msk.bf16.mxu1 %vm1443_vm2, %v1441_v1  ;;  %vm192_vm5 = vcmask 56320   ;;  %v1444_v16 = vmov 0  }
   0xe   :  { %v1591_v5 = vsel %vm145_vm1, %v146_v3, 0  ;;  %v198_v9 = vsel %vm196_vm3, %v197_v7, 0  ;;  %s1832_s28 = sld [smem:[#allocation15_spill]]  ;;  %1367 = vset.pattern.permute.xlu1 %v1444_v16  ;;  %1366 = vset.pattern.permute.xlu0 %v1444_v16 }
   0xf   :  { %s1833_s0 = sld [smem:[#allocation10_spill]] }
  0x11   :  { %v139_v0 = vld [vmem:[%s1829_s6] sm:$0x7]  ;;  %s1834_s6 = sld [smem:[#allocation9_spill]] }
  0x12   :  { %v135_v4 = vld [vmem:[%s1830_s3] sm:$0xff]  ;;  %v149_v8 = vand.u32 %v1591_v5, %v139_v0 }
  0x13   :  { %v191_v6 = vld [vmem:[%s1831_s8] sm:$0xf]  ;;  %v1606_v11 = vpack.c.bf16 %v135_v4, %v135_v4 }
  0x14   :  { %v137_v10 = vld [vmem:[%s1832_s28] sm:$0x3]  ;;  %v200_v12 = vand.u32 %v198_v9, %v191_v6  ;;  %1248 = vmatpush3.bf16.msra.mxu0 %v149_v8 }
  0x15   :  { %v97_v13 = vld [vmem:[%s1833_s0] sm:$0xff]  ;;  %v138_v15 = vpack.c.bf16 %v137_v10, %v137_v10  ;;  %v98_v17 = vld [vmem:[%s1833_s0 + $0x8] sm:$0xf]  ;;  %1259 = vmatprep.subr.bf16.mxu0 %v1441_v1 }
  0x16   :  { %1254 = vmatpush3.bf16.msra.mxu1 %v200_v12  ;;  %100 = vperm.xlu1 %1367, %v97_v13  }
  0x17   :  { %v82_v14 = vld [vmem:[%s1834_s6] sm:$0xff]  ;;  %v83_v18 = vld [vmem:[%s1834_s6 + $0x8] sm:$0xf]  ;;  %1250 = vmatmul.mubr.msk.bf16.vlgmr.msra.gmra.mxu0 %vm140_vm4, %v1606_v11  ;;  %1265 = vmatprep.subr.bf16.mxu1 %v1441_v1 }
  0x18   :  { %85 = vperm.xlu0 %1366, %v82_v14   ;;  %1261 = vmatprep.mubr.msk.bf16.mxu0 %vm1443_vm2, %v1441_v1 }
  0x19   :  { %1256 = vmatmul.mubr.msk.bf16.vlgmr.msra.gmra.mxu1 %vm192_vm5, %v138_v15 }
  0x1a   :  { %1267 = vmatprep.mubr.msk.bf16.mxu1 %vm1443_vm2, %v1441_v1  ;;  %103 = vperm.xlu1 %1367, %v98_v17  }
  0x1c   :  { %88 = vperm.xlu0 %1366, %v83_v18  }
  0x1d   :  { %32 = vsyncpa [#allocation5], 0  ;;  %s1835_s27 = sld [smem:[#allocation11_spill]]  ;;  %vm296_vm6 = vcmask 48128   ;;  %v80_v26 = vlaneseq  ;;  %vm400_vm13 = vcmask 1040384   ;;  %s1445_s3 = smov 96  }
  0x1e   :  { %s1836_s0 = sld [smem:[#allocation16_spill]]  ;;  %vm248_vm14 = vcmask 64512   ;;  %vm396_vm15 = vcmask 15360   ;;  %v1368_v2 = vld [vmem:[%s1800_s11 + $0x8] sm:$0xff]   ;;  %v1369_v3 = vld [vmem:[%s1800_s11] sm:$0xff]   ;;  %vm527_vm5 = vcmask 130048  }
  0x1f   :  { %s1837_s6 = sld [smem:[#allocation13_spill]]  ;;  %v1647_v27 = vand.u32 127, %v80_v26  ;;  %s1447_s29 = smov [#allocation4]  }
  0x20   :  { %s1838_s8 = sld [smem:[#allocation12_spill]]  ;;  %s1146_s11 = sshll.u32 %s1447_s29, 4  ;;  %s1147_s11 = int_to_ptr.vmem [resolvable:$true] %s1146_s11 }
  0x21   :  { %p1382_p1 = scmp.lt.s32.totalorder %s1147_s11, %s1147_s11 }
  0x23   :  { %v113_v19 = vld [vmem:[%s1835_s27 + $0x8] sm:$0xf]  ;;  %v112_v20 = vld [vmem:[%s1835_s27] sm:$0xff]  ;;  %s1446_s27 = smov 64  }
  0x24   :  { %118 = vperm.xlu1 %1367, %v113_v19   ;;  %115 = vperm.xlu0 %1366, %v112_v20   ;;  %v247_v21 = vld [vmem:[%s1836_s0] sm:$0x7] }
  0x25   :  { %v244_v22 = vld [vmem:[%s1837_s6] sm:$0xff]  ;;  %v245_v23 = vld [vmem:[%s1837_s6 + $0x8] sm:$0xf]  ;;  %v301_v24 = vsel %vm145_vm1, %v247_v21, 0  ;;  %vm482_vm1 = vcmask 261120  }
  0x26   :  { %v246_v25 = vpack.c.bf16 %v245_v23, %v244_v22  ;;  %1266 = vmatpush3.bf16.msra.mxu1 %v301_v24  ;;  %v127_v50 = vld [vmem:[%s1838_s8] sm:$0xff] }
  0x27   :  { %1277 = vmatprep.subr.bf16.mxu1 %v1441_v1  ;;  %v1184_v20 = vld [vmem:[%s1799_s10] ss:$0 sm:$0xff]  ;;  %s1377_s10 = scalar_lea.vmem %s1147_s11, 128 }
  0x28   :  { %p1378_p0 = scmp.ne.s32.totalorder %s1147_s11, %s1377_s10  ;;  %p1383_p2 = scmp.lt.s32.totalorder %s1377_s10, %s1377_s10 }
  0x29   :  { %1268 = vmatmul.mubr.msk.bf16.vlgmr.msra.gmra.mxu1 %vm296_vm6, %v246_v25  ;;  %vm529_vm6 = vcmask 125952  }
  0x2a   :  { %1279 = vmatprep.mubr.msk.bf16.mxu1 %vm1443_vm2, %v1441_v1  ;;  %p1384_p3 = por %p1383_p2, %p1382_p1 }
  0x2c   :  { %p1385_p4 = pnand %p1384_p3, %p1378_p0 }
  0x91   :  { %v101_v28 = vpop.permute.xlu1 %100 }
  0x92   :  { %vm105_vm7 = vcmp.eq.s32.totalorder %v101_v28, %v1647_v27 }
  0x93   :  { %v1173_v29 = vsel %vm105_vm7, 1.0, %v1441_v1  ;;  %v86_v33 = vpop.permute.xlu0 %85  ;;  %vm552_vm7 = vcmask 1045504  }
  0x94   :  { %vm90_vm9 = vcmp.eq.s32.totalorder %v86_v33, %v1647_v27 }
  0x95   :  { %v104_v30 = vpop.permute.xlu1 %103  ;;  %v1171_v38 = vsel %vm90_vm9, 1.0, %v1441_v1 }
  0x96   :  { %vm106_vm8 = vcmp.eq.s32.totalorder %v104_v30, %v1647_v27  ;;  %v1370_v30 = vld [vmem:[%s1803_s14] sm:$0xff]  }
  0x97   :  { %v1174_v31 = vsel %vm106_vm8, 1.0, %v1441_v1  ;;  %v89_v34 = vpop.permute.xlu0 %88  ;;  %vm548_vm8 = vcmask 97280  }
  0x98   :  { %v111_v32 = vpack.c.bf16 %v1174_v31, %v1173_v29  ;;  %vm91_vm10 = vcmp.eq.s32.totalorder %v89_v34, %v1647_v27  ;;  %v1185_v31 = vld [vmem:[%s1801_s12] ss:$0 sm:$0xff] }
  0x99   :  { %v1172_v39 = vsel %vm91_vm10, 1.0, %v1441_v1 }
  0x9a   :  { %532 = vxpose.xlu1.c.b16.start.end [1/1] (short) (narrow) %v111_v32, 16  ;;  %v96_v47 = vpack.c.bf16 %v1172_v39, %v1171_v38  ;;  %v596_v38 = vld [vmem:[%s1802_s13] sm:$0x7] }
  0x9f   :  { %v119_v35 = vpop.permute.xlu1 %118  ;;  %v116_v36 = vpop.permute.xlu0 %115 }
  0xa0   :  { %vm121_vm11 = vcmp.eq.s32.totalorder %v119_v35, %v1647_v27  ;;  %vm120_vm12 = vcmp.eq.s32.totalorder %v116_v36, %v1647_v27 }
  0xa1   :  { %v1176_v42 = vsel %vm121_vm11, 1.0, %v1441_v1  ;;  %v1175_v43 = vsel %vm120_vm12, 1.0, %v1441_v1 }
  0xa2   :  { %v126_v51 = vpack.c.bf16 %v1176_v42, %v1175_v43 }
  0xd7   :  { %v185_v37 = vpop.f32.mrf.mxu0 }
  0xd8   :  { %v242_v40 = vpack.c.bf16 %v185_v37, %v185_v37 }
  0xd9   :  { %v236_v41 = vpop.f32.mrf.mxu1  ;;  %v1251_v44 = vpop.f32.mrf.mxu0 }
  0xda   :  { %v243_v45 = vpack.c.bf16 %v236_v41, %v236_v41  ;;  %v253_v46 = vsel %vm196_vm3, %v242_v40, 0  ;;  %345 = vrot.lane.b32.xlu0 %v242_v40, %s1445_s3 }
  0xdb   :  { %v1257_v48 = vpop.f32.mrf.mxu1  ;;  %v188_v49 = vpop.f32.mrf.mxu0  ;;  %1260 = vmatpush3.bf16.msra.mxu0 %v253_v46 }
  0xdc   :  { %v402_v52 = vsel %vm400_vm13, %v243_v45, 0  ;;  %1271 = vmatprep.subr.bf16.mxu0 %v1441_v1 }
  0xdd   :  { %1278 = vmatpush3.bf16.msra.mxu1 %v402_v52  ;;  %v239_v53 = vpop.f32.mrf.mxu1  ;;  %v1252_v54 = vpop.f32.mrf.mxu0  ;;  %v1371_v52 = vld [vmem:[%s1805_s16 + $0x8] sm:$0xff]  }
  0xde   :  { %1291 = vmatprep.subr.bf16.mxu1 %v1441_v1  ;;  %129 = vperm.xlu0 %1366, %v127_v50   ;;  %v1372_v53 = vld [vmem:[%s1805_s16] sm:$0xff]  }
  0xdf   :  { %1262 = vmatmul.mubr.msk.bf16.vlgmr.msra.gmra.mxu0 %vm248_vm14, %v96_v47  ;;  %v1258_v55 = vpop.f32.mrf.mxu1 }
  0xe0   :  { %1280 = vmatmul.mubr.msk.bf16.vlgmr.msra.gmra.mxu1 %vm396_vm15, %v126_v51  ;;  %1273 = vmatprep.mubr.msk.bf16.mxu0 %vm1443_vm2, %v1441_v1 }
  0xe1   :  { %1293 = vmatprep.mubr.msk.bf16.mxu1 %vm1443_vm2, %v1441_v1 }
  0xe2   :  { %693 = vrot.lane.b32.xlu0 %v243_v45, %s1445_s3 }
  0xe9   :  { %v337_v58 = vpop.f32.mrf.mxu1 }
  0xeb   :  { %v1269_v59 = vpop.f32.mrf.mxu1 }
  0xed   :  { %v340_v60 = vpop.f32.mrf.mxu1 }
  0xef   :  { %v1270_v62 = vpop.f32.mrf.mxu1 }
  0xfc   :  { %v540_v42 = vpop.trf.xlu1 }
 0x100   :  { %819 = vxpose.xlu0.c.b16.start.end [1/1] (short) (narrow) %v126_v51, 16 }
 0x14c   :  { %v346_v56 = vpop.permute.xlu0 %345 }
 0x14d   :  { %v351_v57 = vsel %vm196_vm3, %v346_v56, 0 }
 0x14e   :  { %1272 = vmatpush3.bf16.msra.mxu0 %v351_v57 }
 0x14f   :  { %1283 = vmatprep.subr.bf16.mxu0 %v1441_v1 }
 0x151   :  { %1274 = vmatmul.mubr.msk.bf16.vlgmr.msra.gmra.mxu0 %vm248_vm14, %v111_v32 }
 0x152   :  { %1287 = vmatprep.mubr.msk.bf16.mxu0 %vm1443_vm2, %v1441_v1  ;;  %1284 = vmatpush3.bf16.msra.mxu0 %v1368_v2 }
 0x153   :  { %1285 = vmatprep.subr.bf16.mxu0 %v1441_v1 }
 0x156   :  { %1286 = vmatpush3.bf16.msra.mxu0 %v1369_v3 }
 0x157   :  { %1297 = vmatprep.subr.bf16.mxu0 %v1441_v1 }
 0x159   :  { %v130_v61 = vpop.permute.xlu0 %129 }
 0x15a   :  { %vm131_vm0 = vcmp.eq.s32.totalorder %v130_v61, %v1647_v27 }
 0x15b   :  { %v1177_v63 = vsel %vm131_vm0, 1.0, %v1441_v1 }
 0x15c   :  { %v1681_v0 = vpack.c.bf16 %v1177_v63, %v1177_v63 }
 0x15e   :  { %879 = vxpose.xlu1.c.b16.start.end [1/1] (short) (narrow) %v1681_v0, 16 }
 0x162   :  { %1046 = vrot.lane.b32.xlu1 %v236_v41, %s1446_s27  ;;  %v650_v41 = vand.u32 %v596_v38, %v1591_v5  ;;  %v694_v5 = vpop.permute.xlu0 %693  ;;  %v1205_v38 = vld [vmem:[%s1809_s20] ss:$0 sm:$0xff] }
 0x163   :  { %v699_v46 = vsel %vm400_vm13, %v694_v5, 0 }
 0x19f   :  { %v289_v4 = vpop.f32.mrf.mxu0 }
 0x1a0   :  { %v438_v6 = vpop.f32.mrf.mxu1  ;;  %v338_v14 = vadd.f32 %v337_v58, %v289_v4 }
 0x1a1   :  { %v1263_v7 = vpop.f32.mrf.mxu0 }
 0x1a2   :  { %v1281_v8 = vpop.f32.mrf.mxu1  ;;  %v1373_v7 = vld [vmem:[%s1808_s19] sm:$0xff]  }
 0x1a3   :  { %v292_v9 = vpop.f32.mrf.mxu0  ;;  %v1195_v8 = vld [vmem:[%s1806_s17] ss:$0 sm:$0xff] }
 0x1a4   :  { %v441_v10 = vpop.f32.mrf.mxu1  ;;  %v341_v18 = vadd.f32 %v340_v60, %v292_v9  ;;  %v1194_v60 = vld [vmem:[%s1804_s15] ss:$0 sm:$0xff] }
 0x1a5   :  { %v1264_v12 = vpop.f32.mrf.mxu0 }
 0x1a6   :  { %v1282_v13 = vpop.f32.mrf.mxu1 }
 0x211   :  { %v387_v15 = vpop.f32.mrf.mxu0 }
 0x212   :  { %v394_v16 = vadd.f32 %v387_v15, %v338_v14 }
 0x213   :  { %v1275_v17 = vpop.f32.mrf.mxu0 }
 0x214   :  { %v445_v19 = vadd.f32 %v438_v6, %v394_v16  ;;  %v827_v6 = vpop.trf.xlu0  ;;  %v887_v17 = vpop.trf.xlu1 }
 0x215   :  { %v390_v21 = vpop.f32.mrf.mxu0 }
 0x216   :  { %v395_v22 = vadd.f32 %v390_v21, %v341_v18  ;;  %v454_v24 = vadd.f32 %v1184_v20, %v445_v19  ;;  %v1374_v21 = vld [vmem:[%s1807_s18] sm:$0xff]  }
 0x217   :  { %v1276_v23 = vpop.f32.mrf.mxu0 }
 0x218   :  { %v446_v25 = vadd.f32 %v441_v10, %v395_v22  ;;  %v456_v27 = vmax.f32 %v454_v24, 0.0 }
 0x21a   :  { %v455_v26 = vadd.f32 %v1184_v20, %v446_v25 }
 0x21c   :  { %v457_v28 = vmax.f32 %v455_v26, 0.0 }
 0x21e   :  { %v458_v29 = vpack.c.bf16 %v457_v28, %v456_v27 }
 0x220   :  { %1288 = vmatmul.mubr.msk.bf16.vlgmr.msra.gmra.mxu0 %vm482_vm1, %v458_v29 }
 0x221   :  { %1299 = vmatprep.mubr.msk.bf16.mxu0 %vm1443_vm2, %v1441_v1  ;;  %1298 = vmatpush3.bf16.msra.mxu0 %v1370_v30 }
 0x222   :  { %1309 = vmatprep.subr.bf16.mxu0 %v1441_v1 }
 0x2e0   :  { %v520_v32 = vpop.f32.mrf.mxu0 }
 0x2e1   :  { %v521_v33 = vadd.f32 %v1185_v31, %v520_v32 }
 0x2e2   :  { %v1289_v34 = vpop.f32.mrf.mxu0 }
 0x2e3   :  { %528 = vst.msk [vmem:[#allocation2] sm:$0xff] %vm527_vm5, %v521_v33  ;;  %v1376_v34 = vld [vmem:[%s1810_s21] sm:$0xff]  }
 0x2e4   :  { %v523_v35 = vpop.f32.mrf.mxu0 }
 0x2e5   :  { %v524_v36 = vadd.f32 %v1185_v31, %v523_v35 }
 0x2e6   :  { %v1290_v37 = vpop.f32.mrf.mxu0 }
 0x2e7   :  { %530 = vst.msk [vmem:[#allocation2 + $0x8] sm:$0xf] %vm529_vm6, %v524_v36  ;;  %v531_v39 = vpack.c.bf16 %v524_v36, %v521_v33  ;;  %v1375_v33 = vld [vmem:[%s1810_s21 + $0x8] sm:$0xff]   ;;  %v1047_v37 = vpop.permute.xlu1 %1046  ;;  %s1448_s21 = smov [#allocation2]  }
 0x2e8   :  { %s1133_s2 = sshll.u32 %s1448_s21, 4  ;;  %s1134_s2 = int_to_ptr.vmem [resolvable:$true] %s1133_s2 }
 0x2e9   :  { %v554_v40 = vsel %vm552_vm7, %v531_v39, 0 }
 0x2ea   :  { %1292 = vmatpush3.bf16.msra.mxu1 %v554_v40 }
 0x2eb   :  { %1303 = vmatprep.subr.bf16.mxu1 %v1441_v1 }
 0x2ed   :  { %1294 = vmatmul.mubr.msk.bf16.vlgmr.msra.gmra.mxu1 %vm548_vm8, %v540_v42 }
 0x2ee   :  { %1304 = vmatpush3.bf16.msra.mxu1 %v650_v41  ;;  %1305 = vmatprep.mubr.msk.bf16.mxu1 %vm1443_vm2, %v1441_v1 }
 0x2ef   :  { %1315 = vmatprep.subr.bf16.mxu1 %v1441_v1 }
 0x2f5   :  { %1306 = vmatmul.mubr.msk.bf16.vlgmr.msra.gmra.mxu1 %vm140_vm4, %v1606_v11 }
 0x2f6   :  { %1319 = vmatprep.mubr.msk.bf16.mxu1 %vm1443_vm2, %v1441_v1  ;;  %1316 = vmatpush3.bf16.msra.mxu1 %v1371_v52 }
 0x2f7   :  { %1317 = vmatprep.subr.bf16.mxu1 %v1441_v1 }
 0x2fa   :  { %1318 = vmatpush3.bf16.msra.mxu1 %v1372_v53 }
 0x2fb   :  { %1329 = vmatprep.subr.bf16.mxu1 %v1441_v1 }
 0x3ad   :  { %v590_v43 = vpop.f32.mrf.mxu1 }
 0x3ae   :  { %v597_v44 = vpack.c.bf16 %v590_v43, %v590_v43 }
 0x3af   :  { %v1295_v45 = vpop.f32.mrf.mxu1 }
 0x3b0   :  { %1300 = vmatmul.mubr.msk.bf16.vlgmr.msra.gmra.mxu0 %vm527_vm5, %v597_v44 }
 0x3b1   :  { %1310 = vmatpush3.bf16.msra.mxu0 %v699_v46  ;;  %v593_v47 = vpop.f32.mrf.mxu1  ;;  %1311 = vmatprep.mubr.msk.bf16.mxu0 %vm1443_vm2, %v1441_v1 }
 0x3b2   :  { %1323 = vmatprep.subr.bf16.mxu0 %v1441_v1 }
 0x3b3   :  { %v1296_v48 = vpop.f32.mrf.mxu1 }
 0x3b5   :  { %v686_v11 = vpop.f32.mrf.mxu1 }
 0x3b7   :  { %v1307_v49 = vpop.f32.mrf.mxu1 }
 0x3b8   :  { %1312 = vmatmul.mubr.msk.bf16.vlgmr.msra.gmra.mxu0 %vm396_vm15, %v1681_v0 }
 0x3b9   :  { %1324 = vmatpush3.bf16.msra.mxu0 %v554_v40  ;;  %1325 = vmatprep.mubr.msk.bf16.mxu0 %vm1443_vm2, %v1441_v1  ;;  %v689_v50 = vpop.f32.mrf.mxu1 }
 0x3ba   :  { %1335 = vmatprep.subr.bf16.mxu0 %v1441_v1 }
 0x3bb   :  { %v1308_v51 = vpop.f32.mrf.mxu1 }
 0x3c0   :  { %1326 = vmatmul.mubr.msk.bf16.vlgmr.msra.gmra.mxu0 %vm548_vm8, %v827_v6 }
 0x3c1   :  { %1337 = vmatprep.mubr.msk.bf16.mxu0 %vm1443_vm2, %v1441_v1  ;;  %1336 = vmatpush3.bf16.msra.mxu0 %v1373_v7 }
 0x3c2   :  { %1347 = vmatprep.subr.bf16.mxu0 %v1441_v1 }
 0x470   :  { %v643_v54 = vpop.f32.mrf.mxu0 }
 0x471   :  { %v687_v58 = vadd.f32 %v686_v11, %v643_v54 }
 0x472   :  { %v1301_v55 = vpop.f32.mrf.mxu0 }
 0x474   :  { %v646_v56 = vpop.f32.mrf.mxu0 }
 0x476   :  { %v1302_v57 = vpop.f32.mrf.mxu0 }
 0x478   :  { %v735_v59 = vpop.f32.mrf.mxu0 }
 0x479   :  { %v741_v61 = vadd.f32 %v735_v59, %v687_v58 }
 0x47a   :  { %v1313_v62 = vpop.f32.mrf.mxu0 }
 0x47b   :  { %v749_v63 = vadd.f32 %v1194_v60, %v741_v61 }
 0x47c   :  { %v738_v0 = vpop.f32.mrf.mxu0 }
 0x47d   :  { %v750_v2 = vmax.f32 %v749_v63, 0.0 }
 0x47e   :  { %v1314_v3 = vpop.f32.mrf.mxu0 }
 0x47f   :  { %v751_v4 = vpack.c.bf16 %v750_v2, %v750_v2 }
 0x480   :  { %v872_v18 = vpop.f32.mrf.mxu0 }
 0x481   :  { %1320 = vmatmul.mubr.msk.bf16.vlgmr.msra.gmra.mxu1 %vm482_vm1, %v751_v4  ;;  %v944_v19 = vpack.c.bf16 %v872_v18, %v872_v18 }
 0x482   :  { %1331 = vmatprep.mubr.msk.bf16.mxu1 %vm1443_vm2, %v1441_v1  ;;  %v1327_v20 = vpop.f32.mrf.mxu0 }
 0x483   :  { %1338 = vmatmul.mubr.msk.bf16.vlgmr.msra.gmra.mxu0 %vm527_vm5, %v944_v19 }
 0x484   :  { %v875_v22 = vpop.f32.mrf.mxu0  ;;  %1351 = vmatprep.mubr.msk.bf16.mxu0 %vm1443_vm2, %v1441_v1  ;;  %1348 = vmatpush3.bf16.msra.mxu0 %v1375_v33 }
 0x485   :  { %1349 = vmatprep.subr.bf16.mxu0 %v1441_v1 }
 0x486   :  { %v1328_v23 = vpop.f32.mrf.mxu0 }
 0x488   :  { %1350 = vmatpush3.bf16.msra.mxu0 %v1376_v34 }
 0x541   :  { %v812_v9 = vpop.f32.mrf.mxu1 }
 0x542   :  { %v813_v10 = vadd.f32 %v1195_v8, %v812_v9 }
 0x543   :  { %v1321_v12 = vpop.f32.mrf.mxu1  ;;  %v990_v29 = vpop.f32.mrf.mxu0 }
 0x544   :  { %v878_v13 = vpack.c.bf16 %v813_v10, %v813_v10  ;;  %818 = vst.msk [vmem:[#allocation4] sm:$0xff] %vm527_vm5, %v813_v10 }
 0x545   :  { %v815_v14 = vpop.f32.mrf.mxu1  ;;  %v1339_v30 = vpop.f32.mrf.mxu0 }
 0x546   :  { %v899_v15 = vsel %vm196_vm3, %v878_v13, 0 }
 0x547   :  { %v1322_v16 = vpop.f32.mrf.mxu1  ;;  %1330 = vmatpush3.bf16.msra.mxu1 %v899_v15  ;;  %v993_v31 = vpop.f32.mrf.mxu0 }
 0x548   :  { %1341 = vmatprep.subr.bf16.mxu1 %v1441_v1 }
 0x549   :  { %v1340_v32 = vpop.f32.mrf.mxu0 }
 0x54a   :  { %1332 = vmatmul.mubr.msk.bf16.vlgmr.msra.gmra.mxu1 %vm248_vm14, %v887_v17 }
 0x54b   :  { %1343 = vmatprep.mubr.msk.bf16.mxu1 %vm1443_vm2, %v1441_v1  ;;  %1342 = vmatpush3.bf16.msra.mxu1 %v1374_v21 }
 0x60a   :  { %v935_v24 = vpop.f32.mrf.mxu1 }
 0x60b   :  { %v941_v25 = vpack.c.bf16 %v935_v24, %v935_v24 }
 0x60c   :  { %v1333_v26 = vpop.f32.mrf.mxu1 }
 0x60d   :  { %1344 = vmatmul.mubr.msk.bf16.vlgmr.msra.gmra.mxu1 %vm527_vm5, %v941_v25 }
 0x60e   :  { %v938_v27 = vpop.f32.mrf.mxu1 }
 0x610   :  { %v1334_v28 = vpop.f32.mrf.mxu1 }
 0x6cd   :  { %v1039_v35 = vpop.f32.mrf.mxu1 }
 0x6ce   :  { %v1040_v36 = vadd.f32 %v1039_v35, %v990_v29 }
 0x6cf   :  { %v1345_v39 = vpop.f32.mrf.mxu1 }
 0x6d0   :  { %v1049_v40 = vadd.f32 %v1047_v37, %v1040_v36 }
 0x6d1   :  { %v1042_v41 = vpop.f32.mrf.mxu1 }
 0x6d2   :  { %v1057_v42 = vadd.f32 %v1205_v38, %v1049_v40 }
 0x6d3   :  { %v1346_v5 = vpop.f32.mrf.mxu1 }
 0x6d4   :  { %v1058_v43 = vmax.f32 %v1057_v42, 0.0 }
 0x6d6   :  { %v1059_v44 = vpack.c.bf16 %v1058_v43, %v1058_v43 }
 0x6d8   :  { %1352 = vmatmul.mubr.msk.bf16.vlgmr.msra.gmra.mxu0 %vm482_vm1, %v1059_v44 }
 0x6d9   :  { %1388 = shalt.err (!%p1385_p4)
}
 0x6da   :  { %1149 = dma.vmem_to_hbm [thread:$0]  %s1147_s11, 128, %s1813_s24, [#allocation5]  }
 0x6db   :  { %s1397_s30 = scalar_lea.vmem %s1134_s2, 256  ;;  %p1402_p6 = scmp.lt.s32.totalorder %s1134_s2, %s1134_s2 }
 0x6dc   :  { %p1398_p5 = scmp.ne.s32.totalorder %s1134_s2, %s1397_s30  ;;  %p1403_p7 = scmp.lt.s32.totalorder %s1397_s30, %s1397_s30 }
 0x6de   :  { %p1404_p8 = por %p1403_p7, %p1402_p6 }
 0x6e0   :  { %p1405_p9 = pnand %p1404_p8, %p1398_p5 }
 0x6e2   :  { %1408 = shalt.err (!%p1405_p9)
}
 0x6e3   :  { %s1449_s14 = smov 128   ;;  %s1450_s12 = smov 8   ;;  %v1206_v1 = vld [vmem:[%s1811_s22] ss:$0 sm:$0xff]  ;;  %vm1126_vm2 = vcmask 123904  }
 0x6e4   :  { %1139 = dma.vmem_to_hbm [thread:$0]  %s1134_s2, 256, %s1812_s23, [#allocation3], %s1449_s14, %s1449_s14, %s1450_s12  }
 0x6e5   :  { %s1451_s1 = smov [#allocation6]  }
 0x6e6   :  { %s1156_s24 = sshll.u32 %s1451_s1, 4  ;;  %s1157_s24 = int_to_ptr.vmem [resolvable:$true] %s1156_s24 }
 0x6e7   :  { %s1417_s16 = scalar_lea.vmem %s1157_s24, 32  ;;  %p1422_p11 = scmp.lt.s32.totalorder %s1157_s24, %s1157_s24 }
 0x6e8   :  { %p1418_p10 = scmp.ne.s32.totalorder %s1157_s24, %s1417_s16  ;;  %p1423_p12 = scmp.lt.s32.totalorder %s1417_s16, %s1417_s16 }
 0x6ea   :  { %p1424_p13 = por %p1423_p12, %p1422_p11 }
 0x6ec   :  { %p1425_p0 = pnand %p1424_p13, %p1418_p10 }
 0x798   :  { %v1120_v45 = vpop.f32.mrf.mxu0 }
 0x799   :  { %v1121_v46 = vadd.f32 %v1206_v1, %v1120_v45 }
 0x79a   :  { %v1353_v47 = vpop.f32.mrf.mxu0 }
 0x79b   :  { %1127 = vst.msk [vmem:[#allocation6] sm:$0x3] %vm1126_vm2, %v1121_v46 }
 0x79c   :  { %v1123_v48 = vpop.f32.mrf.mxu0 }
 0x79d   :  { %1428 = shalt.err (!%p1425_p0)
}
 0x79e   :  { %1159 = dma.vmem_to_hbm [thread:$0]  %s1157_s24, 32, %s1814_s25, [#allocation5]   ;;  %v1354_v11 = vpop.f32.mrf.mxu0 }
 0x79f   :  { %1437 = dma.done.wait [#allocation3], 256  }
 0x7a0   :  { %1438 = vsyncadd [#allocation3], 4294967040 }
 0x7a1   :  { %1439 = dma.done.wait [#allocation5], 160  }
 0x7a2   :  { %1440 = vsyncadd [#allocation5], 4294967136 }
 0x7a3   :  { %1169 = vsyncpa [#allocation3], 1 }
 0x7a4   :  { %1170 = vsyncpa [#allocation5], 1 }

</bundles_post_ra>
